<compile_context>
chip_gen: v7x
topology: tpu7x:2x2x1
jax: 0.10.0
libtpu: 0.0.40
codegen_flags: <defaults>
</compile_context>

<pallas_src>
import jax
import jax.numpy as jnp
from jax.experimental import pallas as pl
from jax.experimental.pallas import tpu as pltpu


def _prompt_cat_kernel(prefix_ref, ctx_ref, ctx_neg_ref, suffix_ref,
                       prompts_ref, prompts_neg_ref):
    # prefix_ref:  (B, 1, D)        per-class SOS token embedding
    # ctx_ref:     (n_ctx, D)       shared learned context (resident)
    # ctx_neg_ref: (n_ctx, D)       shared learned negative context (resident)
    # suffix_ref:  (B, S, D)        per-class classname + EOS + pad embeddings
    # prompts_ref / prompts_neg_ref: (B, L = 1 + n_ctx + S, D)
    blk_cls, seq_len, ctx_dim = prompts_ref.shape
    n_ctx = ctx_ref.shape[0]

    prefix = prefix_ref[...]                                    # (B, 1, D)
    suffix = suffix_ref[...]                                    # (B, S, D)
    ctx_b = jnp.broadcast_to(ctx_ref[...][None],
                             (blk_cls, n_ctx, ctx_dim))         # (B, n_ctx, D)
    ctx_neg_b = jnp.broadcast_to(ctx_neg_ref[...][None],
                                 (blk_cls, n_ctx, ctx_dim))     # (B, n_ctx, D)

    # Direct slice-stores covering rows [0, L) — no full-tile concat temp in
    # VMEM, and the duplicated work between the two outputs is only the tiny
    # prefix/ctx row ranges (suffix is stored straight through for both).
    prompts_ref[:, 0:1, :] = prefix
    prompts_neg_ref[:, 0:1, :] = prefix
    prompts_ref[:, 1:1 + n_ctx, :] = ctx_b
    prompts_neg_ref[:, 1:1 + n_ctx, :] = ctx_neg_b
    prompts_ref[:, 1 + n_ctx:seq_len, :] = suffix
    prompts_neg_ref[:, 1 + n_ctx:seq_len, :] = suffix


def _choose_class_block(n_cls, n_ctx, seq_len, suf_len, ctx_dim, itemsize,
                        vmem_budget_bytes=24 * 1024 * 1024):
    """Classes per grid step, sized purely from a VMEM working-set budget.

    No hard cap on the block size (v7x feedback): each step should move as
    many MB as the budget allows so the ~0.35 us fixed per-step overhead stays
    negligible.  The step count is then rounded UP to an even number (>= 2
    when n_cls >= 2) so the 'parallel' class axis splits evenly across
    TensorCores, the pipeline overlaps, and the ragged tail (if any) stays as
    large as possible.
    """
    # Double-buffered per-class bytes: prefix + suffix in, two outputs out.
    per_cls = 2 * ((1 + suf_len) + 2 * seq_len) * ctx_dim * itemsize
    # Resident ctx / ctx_neg blocks (counted double-buffered, conservatively).
    resident = 2 * 2 * n_ctx * ctx_dim * itemsize
    blk_max = max(1, (vmem_budget_bytes - resident) // max(per_cls, 1))
    blk_max = int(min(blk_max, n_cls))

    steps = pl.cdiv(n_cls, blk_max)
    if n_cls >= 2:
        steps = max(steps, 2)          # always give the pipeline >= 2 steps
        if steps % 2:                  # even step count -> balanced megacore
            steps += 1
        steps = min(steps, n_cls)
    blk = pl.cdiv(n_cls, steps)
    return int(blk)


def prompt_learner_forward(ctx, ctx_neg, token_prefix, token_suffix,
                           temperature, spatial_T):
    """Pallas implementation of PromptLearner.forward(neg_prompt_wcls=True),
    class_token_position == 'end', generic (non-CSC) context."""
    n_cls = token_prefix.shape[0]
    n_ctx, ctx_dim = ctx.shape
    suf_len = token_suffix.shape[1]
    seq_len = 1 + n_ctx + suf_len
    dtype = token_prefix.dtype
    itemsize = jnp.dtype(dtype).itemsize

    blk_cls = _choose_class_block(n_cls, n_ctx, seq_len, suf_len, ctx_dim,
                                  itemsize)
    grid = (pl.cdiv(n_cls, blk_cls),)

    out_shape = (
        jax.ShapeDtypeStruct((n_cls, seq_len, ctx_dim), dtype),
        jax.ShapeDtypeStruct((n_cls, seq_len, ctx_dim), dtype),
    )

    # Pure data-movement kernel: tell XLA it is bandwidth-bound only.
    bytes_accessed = itemsize * ctx_dim * (
        n_cls * (1 + suf_len)          # prefix + suffix reads
        + 2 * n_ctx                    # ctx + ctx_neg reads
        + 2 * n_cls * seq_len)         # two full outputs written
    cost = pl.CostEstimate(flops=0, transcendentals=0,
                           bytes_accessed=int(bytes_accessed))

    # NOTE: the prefix keeps its (n_cls, 1, ctx_dim) layout so the block's
    # last two dims (1, ctx_dim) equal the array dims / lane width and stay
    # legal for any blk_cls (the (8,128) block-shape rule).  The prefix is
    # <2% of the bytes moved, so the fragmented row DMA is negligible.
    grid_spec = pltpu.PrefetchScalarGridSpec(
        num_scalar_prefetch=0,
        grid=grid,
        in_specs=[
            pl.BlockSpec((blk_cls, 1, ctx_dim), lambda i: (i, 0, 0)),        # prefix
            pl.BlockSpec((n_ctx, ctx_dim), lambda i: (0, 0)),                # ctx (resident)
            pl.BlockSpec((n_ctx, ctx_dim), lambda i: (0, 0)),                # ctx_neg (resident)
            pl.BlockSpec((blk_cls, suf_len, ctx_dim), lambda i: (i, 0, 0)),  # suffix
        ],
        out_specs=[
            pl.BlockSpec((blk_cls, seq_len, ctx_dim), lambda i: (i, 0, 0)),
            pl.BlockSpec((blk_cls, seq_len, ctx_dim), lambda i: (i, 0, 0)),
        ],
    )

    prompts, prompts_neg = pl.pallas_call(
        _prompt_cat_kernel,
        out_shape=out_shape,
        grid_spec=grid_spec,
        cost_estimate=cost,
        compiler_params=pltpu.CompilerParams(
            dimension_semantics=("parallel",),
            vmem_limit_bytes=48 * 1024 * 1024),
    )(token_prefix, ctx, ctx_neg, token_suffix)

    # TODO(synk): 'middle'/'front' class-token positions use per-class ragged
    # name_lens slicing; only the 'end' position (the default hot path) is
    # implemented in the kernel.  CLIP tokenization / token_embedding from
    # __init__ is host-side setup, not kernel work.
    # TODO(synk): the ctx rows written to HBM are identical for every class;
    # if the downstream text encoder can fuse this concat into its own load,
    # those n_ctx*L rows (x2 for pos+neg) need not be materialized per class.
    return prompts, prompts_neg, temperature, spatial_T


def _reference(ctx, ctx_neg, token_prefix, token_suffix):
    n_cls = token_prefix.shape[0]
    n_ctx, ctx_dim = ctx.shape
    ctx_b = jnp.broadcast_to(ctx[None], (n_cls, n_ctx, ctx_dim))
    ctx_neg_b = jnp.broadcast_to(ctx_neg[None], (n_cls, n_ctx, ctx_dim))
    ref_p = jnp.concatenate([token_prefix, ctx_b, token_suffix], axis=1)
    ref_n = jnp.concatenate([token_prefix, ctx_neg_b, token_suffix], axis=1)
    return ref_p, ref_n


if __name__ == "__main__":
    # Small, TPU-friendly synthetic shapes consistent with the module:
    #   n_cls classes, n_ctx learned context tokens, ctx_dim embedding width,
    #   total tokenized prompt length L (CLIP uses 77; shrunk here).
    key = jax.random.PRNGKey(0)
    k_ctx, k_ctx_neg, k_pre, k_suf = jax.random.split(key, 4)

    n_ctx, ctx_dim, L = 4, 128, 16
    suf_len = L - 1 - n_ctx

    # nn.init.normal_(std=0.02) for the learned contexts.
    ctx = 0.02 * jax.random.normal(k_ctx, (n_ctx, ctx_dim), dtype=jnp.float32)
    ctx_neg = 0.02 * jax.random.normal(k_ctx_neg, (n_ctx, ctx_dim),
                                       dtype=jnp.float32)
    temperature = jnp.float32(3.91)
    spatial_T = jnp.float32(3.0)

    ok = True
    # Case 1: n_cls divides evenly into blocks. Case 2: ragged last block.
    for n_cls in (4, 5):
        token_prefix = jax.random.normal(k_pre, (n_cls, 1, ctx_dim),
                                         dtype=jnp.float32)
        token_suffix = jax.random.normal(k_suf, (n_cls, suf_len, ctx_dim),
                                         dtype=jnp.float32)

        prompts, prompts_neg, temp_out, spat_out = prompt_learner_forward(
            ctx, ctx_neg, token_prefix, token_suffix, temperature, spatial_T)
        jax.block_until_ready((prompts, prompts_neg, temp_out, spat_out))

        ref_p, ref_n = _reference(ctx, ctx_neg, token_prefix, token_suffix)
        ok &= prompts.shape == (n_cls, L, ctx_dim)
        ok &= prompts_neg.shape == (n_cls, L, ctx_dim)
        ok &= bool(jnp.allclose(prompts, ref_p))
        ok &= bool(jnp.allclose(prompts_neg, ref_n))

    # Scalars pass through unchanged (compare in float32: 3.91 is inexact).
    ok &= abs(float(temp_out) - 3.91) < 1e-6
    ok &= abs(float(spat_out) - 3.0) < 1e-6

    assert ok
    print("KERNEL_OK")
</pallas_src>

<mosaic_0001>
module attributes {stable_mosaic.version = 11 : i64} {
  func.func @_prompt_cat_kernel(%arg0: i32, %arg1: memref<2x1x128xf32, #tpu.memory_space<vmem>>, %arg2: memref<4x128xf32, #tpu.memory_space<vmem>>, %arg3: memref<4x128xf32, #tpu.memory_space<vmem>>, %arg4: memref<2x11x128xf32, #tpu.memory_space<vmem>>, %arg5: memref<2x16x128xf32, #tpu.memory_space<vmem>>, %arg6: memref<2x16x128xf32, #tpu.memory_space<vmem>>) attributes {dimension_semantics = [#tpu.dimension_semantics<parallel>], iteration_bounds = array<i64: 2>, scalar_prefetch = 0 : i64, scratch_operands = 0 : i64, tpu.core_type = #tpu.core_type<tc>, window_params = [{transform_indices = @transform_0, window_bounds = array<i64: 2, 1, 128>}, {pipeline_mode = #tpu.pipeline_mode<synchronous>, transform_indices = @transform_1, window_bounds = array<i64: 4, 128>}, {pipeline_mode = #tpu.pipeline_mode<synchronous>, transform_indices = @transform_2, window_bounds = array<i64: 4, 128>}, {transform_indices = @transform_3, window_bounds = array<i64: 2, 11, 128>}, {transform_indices = @transform_4, window_bounds = array<i64: 2, 16, 128>}, {transform_indices = @transform_5, window_bounds = array<i64: 2, 16, 128>}]} {
    %c0 = arith.constant 0 : index
    %c0_0 = arith.constant 0 : index
    %c0_1 = arith.constant 0 : index
    %0 = vector.load %arg1[%c0, %c0_0, %c0_1] : memref<2x1x128xf32, #tpu.memory_space<vmem>>, vector<2x1x128xf32>
    %c0_2 = arith.constant 0 : index
    %c0_3 = arith.constant 0 : index
    %c0_4 = arith.constant 0 : index
    %1 = vector.load %arg4[%c0_2, %c0_3, %c0_4] : memref<2x11x128xf32, #tpu.memory_space<vmem>>, vector<2x11x128xf32>
    %c0_5 = arith.constant 0 : index
    %c0_6 = arith.constant 0 : index
    %2 = vector.load %arg2[%c0_5, %c0_6] : memref<4x128xf32, #tpu.memory_space<vmem>>, vector<4x128xf32>
    %3 = vector.shape_cast %2 : vector<4x128xf32> to vector<1x4x128xf32>
    %4 = vector.shape_cast %3 : vector<1x4x128xf32> to vector<1x4x128xf32>
    %5 = vector.broadcast %4 : vector<1x4x128xf32> to vector<2x4x128xf32>
    %c0_7 = arith.constant 0 : index
    %c0_8 = arith.constant 0 : index
    %6 = vector.load %arg3[%c0_7, %c0_8] : memref<4x128xf32, #tpu.memory_space<vmem>>, vector<4x128xf32>
    %7 = vector.shape_cast %6 : vector<4x128xf32> to vector<1x4x128xf32>
    %8 = vector.shape_cast %7 : vector<1x4x128xf32> to vector<1x4x128xf32>
    %9 = vector.broadcast %8 : vector<1x4x128xf32> to vector<2x4x128xf32>
    %c0_9 = arith.constant 0 : index
    %c0_10 = arith.constant 0 : index
    %c0_11 = arith.constant 0 : index
    %10 = vector.load %arg5[%c0_9, %c0_10, %c0_11] : memref<2x16x128xf32, #tpu.memory_space<vmem>>, vector<2x1x128xf32>
    tpu.vector_store %arg5[%c0_9, %c0_10, %c0_11], %0 {strides = array<i32>} : memref<2x16x128xf32, #tpu.memory_space<vmem>>, vector<2x1x128xf32>,
    %c0_12 = arith.constant 0 : index
    %c0_13 = arith.constant 0 : index
    %c0_14 = arith.constant 0 : index
    %11 = vector.load %arg6[%c0_12, %c0_13, %c0_14] : memref<2x16x128xf32, #tpu.memory_space<vmem>>, vector<2x1x128xf32>
    tpu.vector_store %arg6[%c0_12, %c0_13, %c0_14], %0 {strides = array<i32>} : memref<2x16x128xf32, #tpu.memory_space<vmem>>, vector<2x1x128xf32>,
    %c0_15 = arith.constant 0 : index
    %c1 = arith.constant 1 : index
    %c0_16 = arith.constant 0 : index
    %12 = vector.load %arg5[%c0_15, %c1, %c0_16] : memref<2x16x128xf32, #tpu.memory_space<vmem>>, vector<2x4x128xf32>
    tpu.vector_store %arg5[%c0_15, %c1, %c0_16], %5 {strides = array<i32>} : memref<2x16x128xf32, #tpu.memory_space<vmem>>, vector<2x4x128xf32>,
    %c0_17 = arith.constant 0 : index
    %c1_18 = arith.constant 1 : index
    %c0_19 = arith.constant 0 : index
    %13 = vector.load %arg6[%c0_17, %c1_18, %c0_19] : memref<2x16x128xf32, #tpu.memory_space<vmem>>, vector<2x4x128xf32>
    tpu.vector_store %arg6[%c0_17, %c1_18, %c0_19], %9 {strides = array<i32>} : memref<2x16x128xf32, #tpu.memory_space<vmem>>, vector<2x4x128xf32>,
    %c0_20 = arith.constant 0 : index
    %c5 = arith.constant 5 : index
    %c0_21 = arith.constant 0 : index
    %14 = vector.load %arg5[%c0_20, %c5, %c0_21] : memref<2x16x128xf32, #tpu.memory_space<vmem>>, vector<2x11x128xf32>
    tpu.vector_store %arg5[%c0_20, %c5, %c0_21], %1 {strides = array<i32>} : memref<2x16x128xf32, #tpu.memory_space<vmem>>, vector<2x11x128xf32>,
    %c0_22 = arith.constant 0 : index
    %c5_23 = arith.constant 5 : index
    %c0_24 = arith.constant 0 : index
    %15 = vector.load %arg6[%c0_22, %c5_23, %c0_24] : memref<2x16x128xf32, #tpu.memory_space<vmem>>, vector<2x11x128xf32>
    tpu.vector_store %arg6[%c0_22, %c5_23, %c0_24], %1 {strides = array<i32>} : memref<2x16x128xf32, #tpu.memory_space<vmem>>, vector<2x11x128xf32>,
    return
  }
  func.func @transform_0(%arg0: i32) -> (i32, i32, i32) {
    %c0_i32 = arith.constant 0 : i32
    %c0_i32_0 = arith.constant 0 : i32
    %c0_i32_1 = arith.constant 0 : i32
    return %arg0, %c0_i32, %c0_i32_0 : i32, i32, i32
  }
  func.func @transform_1(%arg0: i32) -> (i32, i32) {
    %c0_i32 = arith.constant 0 : i32
    %c0_i32_0 = arith.constant 0 : i32
    %c0_i32_1 = arith.constant 0 : i32
    return %c0_i32, %c0_i32_0 : i32, i32
  }
  func.func @transform_2(%arg0: i32) -> (i32, i32) {
    %c0_i32 = arith.constant 0 : i32
    %c0_i32_0 = arith.constant 0 : i32
    %c0_i32_1 = arith.constant 0 : i32
    return %c0_i32, %c0_i32_0 : i32, i32
  }
  func.func @transform_3(%arg0: i32) -> (i32, i32, i32) {
    %c0_i32 = arith.constant 0 : i32
    %c0_i32_0 = arith.constant 0 : i32
    %c0_i32_1 = arith.constant 0 : i32
    return %arg0, %c0_i32, %c0_i32_0 : i32, i32, i32
  }
  func.func @transform_4(%arg0: i32) -> (i32, i32, i32) {
    %c0_i32 = arith.constant 0 : i32
    %c0_i32_0 = arith.constant 0 : i32
    %c0_i32_1 = arith.constant 0 : i32
    return %arg0, %c0_i32, %c0_i32_0 : i32, i32, i32
  }
  func.func @transform_5(%arg0: i32) -> (i32, i32, i32) {
    %c0_i32 = arith.constant 0 : i32
    %c0_i32_0 = arith.constant 0 : i32
    %c0_i32_1 = arith.constant 0 : i32
    return %arg0, %c0_i32, %c0_i32_0 : i32, i32, i32
  }
}

</mosaic_0001>

<bundles_post_ra>
// kernel: tpu_custom_call.1
= control target key start
LH: loop header
LB: loop body
LE: loop exit
PB: predicated region body
PF: predicated region fallthrough
CT: control target
= control target key end

     0   :  { %11 = vsyncpa [#allocation3], 0  ;;  %s787_s0 = inlined_call_operand.vmem [shape: f32[4,1,128], index: 0, kind: input, shape index: {}]   ;;  %s788_s1 = inlined_call_operand.vmem [shape: f32[4,128], index: 1, kind: input, shape index: {}]   ;;  %s789_s2 = inlined_call_operand.vmem [shape: f32[4,128], index: 2, kind: input, shape index: {}]   ;;  %s790_s3 = inlined_call_operand.vmem [shape: f32[4,11,128], index: 3, kind: input, shape index: {}]   ;;  %s791_s4 = inlined_call_operand.hbm [shape: f32[4,16,128], index: 4, kind: output, shape index: {0}]   ;;  %s792_s5 = inlined_call_operand.hbm [shape: f32[4,16,128], index: 5, kind: output, shape index: {1}]  }
   0x1   :  { %13 = vsyncpa [#allocation3 + $0x1], 0 }
   0x2   :  { %14 = vsyncpa [#allocation5], 0 }
   0x3   :  { %16 = vsyncpa [#allocation5 + $0x1], 0  ;;  %s625_s18 = smov 0   ;;  %s627_s19 = smov 0  }
   0x4   :  { %s629_s20 = smov 0   ;;  %s631_s21 = smov 0  }
   0x5 LB: > { %s646_s22 = sadd.s32 4294967295, %s589_s21   ;;  %s424_s23 = sadd.s32 4294967294, %s589_s21   ;;  %s589_s21 = sphi %s631_s21, %s798_s21   ;;  %s585_s20 = sphi %s629_s20, %s797_s20   ;;  %s581_s19 = sphi %s627_s19, %s796_s19   ;;  %s577_s18 = sphi %s625_s18, %s795_s18  }
   0x6   : > { %s650_s24 = sadd.s32 1, %s589_s21   ;;  %s123_s25 = sadd.s32 1, %s585_s20 }
   0x7   : > { %s120_s26 = ssub.s32 %s589_s21, %s650_s24  ;;  %p133_p0 = scmp.ne.s32.totalorder %s585_s20, %s581_s19 }
   0x8   : > { %p121_p1 = scmp.eq.s32.totalorder %s120_s26, 0  ;;  %p134_p2 = scmp.eq.s32.totalorder %s646_s22, 1 }
   0x9   : > { %p139_p3 = scmp.ne.s32.totalorder %s581_s19, %s577_s18  ;;  %p140_p4 = scmp.eq.s32.totalorder %s424_s23, 1 }
   0xa   : > { %s661_s27 = scalar_select %p121_p1, %s585_s20, %s123_s25  }
   0xb   : > { %p663_p5 = por %p134_p2, %p133_p0  ;;  %p667_p6 = por %p140_p4, %p139_p3 }
   0xc   : > { %p427_p7 = scmp.ge.s32.totalorder %s589_s21, 1  ;;  %p208_p8 = scmp.lt.s32.totalorder %s589_s21, 3 }
   0xe   : > { %p209_p9 = pnand %p427_p7, %p208_p8 }
   0xf   : > { %s674_s30 = sand.u32 (!%p209_p9), 1, %s581_s19   ;;  %s430_s6 = sshll.u32 (!%p209_p9), %s646_s22, 1  ;;  %v266_v0 = vld [vmem:[%s788_s1] sm:$0xf] (!%p209_p9) }
  0x10   : > { %212 = sbr.rel (%p209_p9) target bundleno = 74 (0x4a), region = 36  ;;  %s428_s9 = sshll.u32 (!%p209_p9), %s674_s30, 5  ;;  %v267_v1 = vld [vmem:[%s789_s2] sm:$0xf] (!%p209_p9) }
  0x11   : > { %p247_p10 = scmp.lt.s32.totalorder (!%p209_p9), %s430_s6, 3  ;;  %s681_s10 = scalar_lea.vmem (!%p209_p9), [#allocation2], %s428_s9 }
  0x12   : > { %272 = vst [vmem:[%s681_s10 + $0x1] sm:$0xf] (!%p209_p9), %v266_v0  ;;  %273 = vst [vmem:[%s681_s10 + $0x11] sm:$0xf] (!%p209_p9), %v266_v0  ;;  %s304_s11 = sshll.u32 (!%p209_p9), %s681_s10, 4  ;;  %s245_s23 = scalar_lea.vmem (!%p209_p9), [#allocation4], %s428_s9  ;;  %s692_s11 = int_to_ptr.vmem [resolvable:$true] %s304_s11 }
  0x13   : > { %s321_s25 = sshll.u32 (!%p209_p9), %s245_s23, 4  ;;  %274 = vst [vmem:[%s245_s23 + $0x1] sm:$0xf] (!%p209_p9), %v267_v1  ;;  %275 = vst [vmem:[%s245_s23 + $0x11] sm:$0xf] (!%p209_p9), %v267_v1  ;;  %s591_s26 = smov (!%p209_p9), [#allocation2]   ;;  %s699_s25 = int_to_ptr.vmem [resolvable:$true] %s321_s25 }
  0x14   : > { %s499_s7 = sshll.u32 (!%p209_p9), %s591_s26, 4  ;;  %s500_s7 = int_to_ptr.vmem [resolvable:$false] %s499_s7 }
  0x15   : > { %p502_p0 = scmp.lt.s32.totalorder (!%p209_p9), %s692_s11, %s500_s7 }
  0x17   : > { %s800_s6 = smov (!%p247_p10, %s430_s6), 3 }
  0x18   : > { %s249_s16 = scalar_lea.vmem %s787_s0, %s800_s6  ;;  %s444_s17 = sshll.u32 %s800_s6, 4 }
  0x19   : > { %v260_v2 = vld [vmem:[%s249_s16] sm:$0x1]  ;;  %v261_v3 = vld [vmem:[%s249_s16 + $0x1] sm:$0x1]  ;;  %s256_s8 = scalar_lea.vmem %s790_s3, %s444_s17  ;;  %s446_s6 = sshll.u32 %s646_s22, 9 }
  0x1a   : > { %268 = vst [vmem:[%s681_s10] sm:$0x1] %v260_v2  ;;  %269 = vst [vmem:[%s681_s10 + $0x10] sm:$0x1] %v261_v3  ;;  %v262_v4 = vld [vmem:[%s256_s8] sm:$0xff]  ;;  %v263_v5 = vld [vmem:[%s256_s8 + $0x8] sm:$0x7]  ;;  %s708_s13 = scalar_lea.hbm %s791_s4, %s446_s6  ;;  %s714_s16 = scalar_lea.hbm %s792_s5, %s446_s6 }
  0x1b   : > { %270 = vst [vmem:[%s245_s23] sm:$0x1] %v260_v2  ;;  %271 = vst [vmem:[%s245_s23 + $0x10] sm:$0x1] %v261_v3  ;;  %v264_v6 = vld [vmem:[%s256_s8 + $0x10] sm:$0xff]  ;;  %v265_v7 = vld [vmem:[%s256_s8 + $0x18] sm:$0x7] }
  0x1c   : > { %276 = vst [vmem:[%s681_s10 + $0x5] sm:$0xff] %v262_v4  ;;  %280 = vst [vmem:[%s245_s23 + $0x5] sm:$0xff] %v262_v4  ;;  %s285_s22 = scalar_lea.sflag [#allocation3], %s674_s30  ;;  %s495_s17 = scalar_lea.vmem %s692_s11, 512 }
  0x1d   : > { %277 = vst [vmem:[%s681_s10 + $0xd] sm:$0x7] %v263_v5  ;;  %281 = vst [vmem:[%s245_s23 + $0xd] sm:$0x7] %v263_v5  ;;  %p496_p11 = scmp.ne.s32.totalorder %s692_s11, %s495_s17  ;;  %s501_s8 = scalar_lea.vmem %s500_s7, 1024 }
  0x1e   : > { %278 = vst [vmem:[%s681_s10 + $0x15] sm:$0xff] %v264_v6  ;;  %282 = vst [vmem:[%s245_s23 + $0x15] sm:$0xff] %v264_v6  ;;  %p503_p1 = scmp.lt.s32.totalorder %s501_s8, %s495_s17 }
  0x1f   : > { %279 = vst [vmem:[%s681_s10 + $0x1d] sm:$0x7] %v265_v7  ;;  %283 = vst [vmem:[%s245_s23 + $0x1d] sm:$0x7] %v265_v7  ;;  %p497_p12 = pnand %p496_p11, %p663_p5 }
  0x20   : > { %p504_p2 = por %p503_p1, %p502_p0 }
  0x21   : > { %p498_p13 = pneg %p497_p12 }
  0x23   : > { %p505_p3 = pnand %p504_p2, %p498_p13 }
  0x25   : > { %508 = shalt.err (!%p505_p3)
}
  0x26   : > { %s509_s10 = scalar_lea.hbm %s708_s13, 512  ;;  %s513_s9 = scalar_lea.hbm %s791_s4, 1024 }
  0x27   : > { %p510_p4 = scmp.ne.s32.totalorder %s708_s13, %s509_s10  ;;  %p514_p9 = scmp.lt.u32.totalorder %s708_s13, %s791_s4 }
  0x28   : > { %p515_p10 = scmp.lt.u32.totalorder %s513_s9, %s509_s10  ;;  %p517_p12 = scmp.lt.u32.totalorder %s509_s10, %s708_s13 }
  0x29   : > { %p511_p7 = pnand %p510_p4, %p663_p5 }
  0x2a   : > { %p516_p11 = por %p515_p10, %p514_p9 }
  0x2b   : > { %p512_p8 = pneg %p511_p7 }
  0x2c   : > { %p518_p13 = por %p517_p12, %p516_p11 }
  0x2e   : > { %p519_p0 = pnand %p518_p13, %p512_p8 }
  0x30   : > { %522 = shalt.err (!%p519_p0)
}
  0x31   : > { %s592_s15 = smov 128   ;;  %s593_s17 = smov 8  }
  0x32   : > { %449 = dma.vmem_to_hbm [thread:$0]  (%p663_p5), %s692_s11, 512, %s708_s13, %s285_s22, %s592_s15, %s592_s15, %s593_s17  }
  0x33   : > { %s290_s26 = scalar_lea.sflag [#allocation5], %s674_s30  ;;  %s523_s7 = scalar_lea.vmem %s699_s25, 512 }
  0x34   : > { %p524_p1 = scmp.ne.s32.totalorder %s699_s25, %s523_s7  ;;  %s594_s8 = smov [#allocation4]  }
  0x35   : > { %s527_s10 = sshll.u32 %s594_s8, 4  ;;  %s528_s10 = int_to_ptr.vmem [resolvable:$false] %s527_s10 }
  0x36   : > { %p525_p2 = pnand %p524_p1, %p663_p5  ;;  %s529_s23 = scalar_lea.vmem %s528_s10, 1024 }
  0x37   : > { %p530_p4 = scmp.lt.s32.totalorder %s699_s25, %s528_s10  ;;  %p531_p7 = scmp.lt.s32.totalorder %s529_s23, %s523_s7 }
  0x38   : > { %p526_p3 = pneg %p525_p2 }
  0x39   : > { %p532_p8 = por %p531_p7, %p530_p4 }
  0x3b   : > { %p533_p9 = pnand %p532_p8, %p526_p3 }
  0x3d   : > { %536 = shalt.err (!%p533_p9)
}
  0x3e   : > { %s537_s11 = scalar_lea.hbm %s714_s16, 512  ;;  %s541_s6 = scalar_lea.hbm %s792_s5, 1024 }
  0x3f   : > { %p538_p10 = scmp.ne.s32.totalorder %s714_s16, %s537_s11  ;;  %p542_p13 = scmp.lt.u32.totalorder %s714_s16, %s792_s5 }
  0x40   : > { %p543_p0 = scmp.lt.u32.totalorder %s541_s6, %s537_s11  ;;  %p545_p2 = scmp.lt.u32.totalorder %s537_s11, %s714_s16 }
  0x41   : > { %p539_p11 = pnand %p538_p10, %p663_p5 }
  0x42   : > { %p544_p1 = por %p543_p0, %p542_p13 }
  0x43   : > { %p540_p12 = pneg %p539_p11 }
  0x44   : > { %p546_p3 = por %p545_p2, %p544_p1 }
  0x46   : > { %p547_p4 = pnand %p546_p3, %p540_p12 }
  0x48   : > { %550 = shalt.err (!%p547_p4)
}
  0x49   : > { %450 = dma.vmem_to_hbm [thread:$0]  (%p663_p5), %s699_s25, 512, %s714_s16, %s290_s26, %s592_s15, %s592_s15, %s593_s17  }
  0x4a PF: > { %p460_p7 = scmp.ge.s32.totalorder %s589_s21, 2  ;;  %s336_s14 = sand.u32 1, %s577_s18  }
  0x4b   : > { %s337_s7 = scalar_lea.sflag [#allocation3], %s336_s14 }
  0x4c   : > { %p454_p8 = pnand %p460_p7, %p667_p6 }
  0x4e   : > { %568 = dma.done.wait (!%p454_p8), %s337_s7, 512  }
  0x4f   : > { %570 = vsyncadd (!%p454_p8), %s337_s7, 4294966784  ;;  %s346_s28 = scalar_lea.sflag [#allocation5], %s336_s14 }
  0x50   : > { %572 = dma.done.wait (!%p454_p8), %s346_s28, 512  }
  0x51   : > { %574 = vsyncadd (!%p454_p8), %s346_s28, 4294966784  ;;  %p19_p5 = scmp.ge.s32.totalorder %s650_s24, 4   ;;  %s795_s18 = smov %s581_s19 }
  0x52   : > { %s796_s19 = smov %s585_s20  ;;  %s797_s20 = smov %s661_s27 }
  0x53   : > { %s798_s21 = smov %s650_s24  ;;  %21 = sbr.rel (!%p19_p5) target bundleno = 5 (0x5), region = 91 }
  0x5a   :  { %351 = vsyncpa [#allocation3], 1 }
  0x5b   :  { %353 = vsyncpa [#allocation3 + $0x1], 1 }
  0x5c   :  { %354 = vsyncpa [#allocation5], 1 }
  0x5d   :  { %356 = vsyncpa [#allocation5 + $0x1], 1 }

</bundles_post_ra>
